<compile_context>
chip_gen: v6e
topology: v6e:2x2x1
jax: 0.10.0
libtpu: 0.0.40
codegen_flags: <defaults>
</compile_context>

<pallas_src>
import functools

import jax
import jax.numpy as jnp
from jax.experimental import pallas as pl
from jax.experimental.pallas import tpu as pltpu

_MIB = 1024 * 1024


def _round_up(x, m):
    return ((x + m - 1) // m) * m


def _round_down(x, m):
    return (x // m) * m


@functools.lru_cache(maxsize=1)
def _tpu_caps():
    """Return (has_bf16_valu, vmem_capacity_bytes) with conservative fallbacks."""
    vmem_cap = 64 * _MIB          # v7x-safe default if the query fails
    has_bf16_valu = True
    try:
        vmem_cap = int(pltpu.get_tpu_info().vmem_capacity_bytes)
    except Exception:
        pass
    try:
        kind = jax.devices()[0].device_kind.lower()
        # v5e and earlier generations have no bf16 VALU -> f32 second pass.
        if any(tag in kind for tag in ("v2", "v3", "v4", "v5")):
            has_bf16_valu = False
    except Exception:
        pass
    return has_bf16_valu, vmem_cap


def _rmsnorm_kernel(x_ref, w_ref, o_ref, *, epsilon, inv_h, packed):
    # x_ref: (TR, Hp) input tile;  w_ref: (1, Hp) weight;  o_ref: (TR, Hp) out.
    #
    # Pass 1: f32 second-moment statistics.  Streams x (load/cast/square/
    # accumulate per vreg) -- no full-tile f32 value stays live across the
    # reduction, so nothing spills to VMEM.
    x1 = x_ref[...].astype(jnp.float32)
    ssq = jnp.sum(x1 * x1, axis=-1, keepdims=True)          # (TR, 1) f32
    inv = jax.lax.rsqrt(ssq * inv_h + epsilon)               # (TR, 1) f32, EUP

    # Pass 2: re-read x_ref (extra 2B/elem of vld; 3 vld slots available)
    # rather than materializing a persistent f32 tile.
    if packed:
        # bf16 second pass (v6e/v7x bf16 VALU): half the vregs / VALU issues
        # for the two multiplies, no full-tile f32->bf16 pack.
        o_ref[...] = (x_ref[...] * inv.astype(o_ref.dtype)) * w_ref[...]
    else:
        # f32 second pass with a single pack at the store (v5e has no bf16
        # VALU; this is also the exact path for f32 outputs).
        y = x_ref[...].astype(jnp.float32) * inv
        o_ref[...] = (y * w_ref[...].astype(jnp.float32)).astype(o_ref.dtype)


def rmsnorm(hidden_states, weight, epsilon=1e-6, *, tile_rows=None,
            vmem_budget_bytes=None):
    """Pallas RMSNorm. hidden_states: (..., H), weight: (H,)."""
    orig_shape = hidden_states.shape
    H = int(orig_shape[-1])
    x2d = hidden_states.reshape(-1, H)
    R = x2d.shape[0]

    # torch semantics: 16-bit weight -> output in weight dtype; otherwise the
    # f32-promoted product stays f32.  (f64 weights are cast to f32.)
    if weight.dtype in (jnp.float16, jnp.bfloat16):
        out_dtype = weight.dtype
    else:
        weight = weight.astype(jnp.float32)
        out_dtype = jnp.float32

    has_bf16_valu, vmem_cap = _tpu_caps()
    packed = bool(has_bf16_valu
                  and x2d.dtype == jnp.bfloat16
                  and out_dtype == jnp.bfloat16)

    # --- Lane padding: keep output stores lane-dense (unmasked vst). --------
    # Typical model hidden sizes are multiples of 128; the pad path is a
    # rarely-taken fallback (one XLA pad copy in exchange for dense stores).
    H_pad = _round_up(H, 128)
    w2d = weight.reshape(1, H)
    if H_pad != H:
        x2d = jnp.pad(x2d, ((0, 0), (0, H_pad - H)))
        w2d = jnp.pad(w2d, ((0, 0), (0, H_pad - H)))

    # --- VMEM budget (generation-aware) & byte-targeted row-tile sizing. ----
    if vmem_budget_bytes is None:
        vmem_budget_bytes = 48 * _MIB if vmem_cap >= 100 * _MIB else 24 * _MIB

    row_align = 16 if x2d.dtype in (jnp.bfloat16, jnp.float16) else 8
    R_aligned = _round_up(R, row_align)
    in_b = H_pad * x2d.dtype.itemsize
    out_b = H_pad * jnp.dtype(out_dtype).itemsize
    per_row_pipe = 2 * (in_b + out_b)        # double-buffered input + output

    if tile_rows is None:
        budget_rows = max(row_align,
                          _round_down(vmem_budget_bytes // per_row_pipe, row_align))
        tile_rows = min(budget_rows, R_aligned)
        # Keep >=2 grid steps (double-buffer overlap + v7x dual-TC sharding)
        # once a half-size tile is still comfortably past the ~2 MiB DMA knee.
        if tile_rows >= R_aligned and R_aligned > row_align:
            half_rows = _round_up((R_aligned + 1) // 2, row_align)
            if half_rows < R_aligned and half_rows * in_b >= 2 * _MIB:
                tile_rows = half_rows
    else:
        tile_rows = max(row_align, _round_up(int(tile_rows), row_align))
        tile_rows = min(tile_rows, R_aligned)

    # Fallback shrink (user override / pathological H).
    while tile_rows > row_align and tile_rows * per_row_pipe > vmem_budget_bytes:
        tile_rows = max(row_align, _round_down(tile_rows // 2, row_align) or row_align)

    grid = (pl.cdiv(R, tile_rows),)          # ragged last block is masked

    # Scoped-VMEM limit: pipelined footprint + slack for Mosaic temporaries
    # and the double-buffered weight block, clamped under physical VMEM.
    footprint = tile_rows * per_row_pipe + 2 * H_pad * w2d.dtype.itemsize
    vmem_limit = int(max(16 * _MIB,
                         min(vmem_cap - 8 * _MIB,
                             max(32 * _MIB, footprint + 16 * _MIB))))

    kernel = functools.partial(_rmsnorm_kernel, epsilon=float(epsilon),
                               inv_h=1.0 / float(H), packed=packed)

    out = pl.pallas_call(
        kernel,
        out_shape=jax.ShapeDtypeStruct((R, H_pad), out_dtype),
        grid_spec=pltpu.PrefetchScalarGridSpec(
            num_scalar_prefetch=0,
            grid=grid,
            in_specs=[
                pl.BlockSpec((tile_rows, H_pad), lambda i: (i, 0)),
                # constant (0, 0) block -> weight stays resident across steps
                pl.BlockSpec((1, H_pad), lambda i: (0, 0)),
            ],
            out_specs=pl.BlockSpec((tile_rows, H_pad), lambda i: (i, 0)),
        ),
        compiler_params=pltpu.CompilerParams(
            dimension_semantics=("parallel",),
            vmem_limit_bytes=vmem_limit,
        ),
    )(x2d, w2d)

    if H_pad != H:
        out = out[:, :H]
    return out.reshape(orig_shape[:-1] + (H,))


def rmsnorm_ref(hidden_states, weight, epsilon=1e-6):
    """Pure-JAX reference matching the PyTorch module."""
    variance = jnp.mean(hidden_states.astype(jnp.float32) ** 2, axis=-1, keepdims=True)
    hs = hidden_states * jax.lax.rsqrt(variance + epsilon)
    if weight.dtype in (jnp.float16, jnp.bfloat16):
        hs = hs.astype(weight.dtype)
    else:
        weight = weight.astype(jnp.float32)
    return weight * hs


def _check(name, out, ref, atol=2e-2, rtol=2e-2):
    assert out.shape == ref.shape, (name, out.shape, ref.shape)
    assert out.dtype == ref.dtype, (name, out.dtype, ref.dtype)
    o = out.astype(jnp.float32)
    r = ref.astype(jnp.float32)
    err = float(jnp.max(jnp.abs(o - r) - rtol * jnp.abs(r)))
    assert err <= atol, f"{name}: tolerance exceeded (excess err {err:.4e})"


if __name__ == "__main__":
    key = jax.random.PRNGKey(0)
    k1, k2, k3, k4, k5, k6 = jax.random.split(key, 6)

    # Case 1: bf16 activations + bf16 weight (packed bf16 second pass on v6e/v7x).
    xa = jax.random.normal(k1, (2, 8, 128), dtype=jnp.float32).astype(jnp.bfloat16)
    wa = (1.0 + 0.01 * jax.random.normal(k2, (128,), dtype=jnp.float32)).astype(jnp.bfloat16)
    outa = jax.block_until_ready(rmsnorm(xa, wa, epsilon=1e-6))
    _check("bf16", outa, rmsnorm_ref(xa, wa, epsilon=1e-6))

    # Case 2: ragged row count (15 rows) + f32 weight (f32-output path).
    xb = jax.random.normal(k3, (3, 5, 256), dtype=jnp.float32).astype(jnp.bfloat16)
    wb = 1.0 + 0.01 * jax.random.normal(k4, (256,), dtype=jnp.float32)
    outb = jax.block_until_ready(rmsnorm(xb, wb, epsilon=1e-6))
    _check("f32-out", outb, rmsnorm_ref(xb, wb, epsilon=1e-6))

    # Case 3: hidden not a multiple of 128 -> wrapper pads the lane dim.
    xc = jax.random.normal(k5, (2, 7, 40), dtype=jnp.float32).astype(jnp.bfloat16)
    wc = (1.0 + 0.01 * jax.random.normal(k6, (40,), dtype=jnp.float32)).astype(jnp.bfloat16)
    outc = jax.block_until_ready(rmsnorm(xc, wc, epsilon=1e-6))
    _check("padded-H", outc, rmsnorm_ref(xc, wc, epsilon=1e-6))

    print("KERNEL_OK")
</pallas_src>

<mosaic_0001>
module attributes {stable_mosaic.version = 11 : i64} {
  func.func @_rmsnorm_kernel(%arg0: i32, %arg1: memref<16x128xbf16, #tpu.memory_space<vmem>>, %arg2: memref<1x128xbf16, #tpu.memory_space<vmem>>, %arg3: memref<16x128xbf16, #tpu.memory_space<vmem>>) attributes {dimension_semantics = [#tpu.dimension_semantics<parallel>], iteration_bounds = array<i64: 1>, scalar_prefetch = 0 : i64, scratch_operands = 0 : i64, tpu.core_type = #tpu.core_type<tc>, window_params = [{transform_indices = @transform_0, window_bounds = array<i64: 16, 128>}, {pipeline_mode = #tpu.pipeline_mode<synchronous>, transform_indices = @transform_1, window_bounds = array<i64: 1, 128>}, {transform_indices = @transform_2, window_bounds = array<i64: 16, 128>}]} {
    %c0 = arith.constant 0 : index
    %c0_0 = arith.constant 0 : index
    %0 = vector.load %arg1[%c0, %c0_0] : memref<16x128xbf16, #tpu.memory_space<vmem>>, vector<16x128xbf16>
    %1 = arith.extf %0 : vector<16x128xbf16> to vector<16x128xf32>
    %2 = arith.mulf %1, %1 : vector<16x128xf32>
    %cst = arith.constant dense<0.000000e+00> : vector<16xf32>
    %3 = vector.multi_reduction <add>, %2, %cst [1] : vector<16x128xf32> to vector<16xf32>
    %4 = vector.shape_cast %3 : vector<16xf32> to vector<16x1xf32>
    %cst_1 = arith.constant 7.812500e-03 : f32
    %5 = vector.broadcast %cst_1 : f32 to vector<16x1xf32>
    %6 = arith.mulf %4, %5 : vector<16x1xf32>
    %cst_2 = arith.constant 9.99999997E-7 : f32
    %7 = vector.broadcast %cst_2 : f32 to vector<16x1xf32>
    %8 = arith.addf %6, %7 : vector<16x1xf32>
    %9 = math.rsqrt %8 : vector<16x1xf32>
    %c0_3 = arith.constant 0 : index
    %c0_4 = arith.constant 0 : index
    %10 = vector.load %arg1[%c0_3, %c0_4] : memref<16x128xbf16, #tpu.memory_space<vmem>>, vector<16x128xbf16>
    %11 = arith.truncf %9 : vector<16x1xf32> to vector<16x1xbf16>
    %12 = vector.broadcast %11 : vector<16x1xbf16> to vector<16x128xbf16>
    %13 = arith.mulf %10, %12 : vector<16x128xbf16>
    %c0_5 = arith.constant 0 : index
    %c0_6 = arith.constant 0 : index
    %14 = vector.load %arg2[%c0_5, %c0_6] : memref<1x128xbf16, #tpu.memory_space<vmem>>, vector<1x128xbf16>
    %15 = vector.broadcast %14 : vector<1x128xbf16> to vector<16x128xbf16>
    %16 = arith.mulf %13, %15 : vector<16x128xbf16>
    %c0_7 = arith.constant 0 : index
    %c0_8 = arith.constant 0 : index
    %17 = vector.load %arg3[%c0_7, %c0_8] : memref<16x128xbf16, #tpu.memory_space<vmem>>, vector<16x128xbf16>
    tpu.vector_store %arg3[%c0_7, %c0_8], %16 {strides = array<i32>} : memref<16x128xbf16, #tpu.memory_space<vmem>>, vector<16x128xbf16>,
    return
  }
  func.func @transform_0(%arg0: i32) -> (i32, i32) {
    %c0_i32 = arith.constant 0 : i32
    %c0_i32_0 = arith.constant 0 : i32
    return %arg0, %c0_i32 : i32, i32
  }
  func.func @transform_1(%arg0: i32) -> (i32, i32) {
    %c0_i32 = arith.constant 0 : i32
    %c0_i32_0 = arith.constant 0 : i32
    %c0_i32_1 = arith.constant 0 : i32
    return %c0_i32, %c0_i32_0 : i32, i32
  }
  func.func @transform_2(%arg0: i32) -> (i32, i32) {
    %c0_i32 = arith.constant 0 : i32
    %c0_i32_0 = arith.constant 0 : i32
    return %arg0, %c0_i32 : i32, i32
  }
}

</mosaic_0001>

<bundles_post_ra>
// kernel: tpu_custom_call.1
= control target key start
LH: loop header
LB: loop body
LE: loop exit
PB: predicated region body
PF: predicated region fallthrough
CT: control target
= control target key end

     0   :  { %7 = vsyncpa [#allocation3], 0  ;;  %s192_s0 = inlined_call_operand.hbm [shape: bf16[16,128], index: 0, kind: input, shape index: {}]   ;;  %s193_s1 = inlined_call_operand.vmem [shape: bf16[1,128], index: 1, kind: input, shape index: {}]   ;;  %s194_s2 = inlined_call_operand.hbm [shape: bf16[16,128], index: 2, kind: output, shape index: {}]  }
   0x1   :  { %8 = vsyncpa [#allocation4], 0  ;;  %s156_s9 = smov [#allocation2]  }
   0x2   :  { %s14_s10 = sshll.u32 %s156_s9, 4  ;;  %s15_s10 = int_to_ptr.vmem [resolvable:$true] %s14_s10 }
   0x3   :  { %s120_s11 = scalar_lea.vmem %s15_s10, 128  ;;  %p125_p1 = scmp.lt.s32.totalorder %s15_s10, %s15_s10 }
   0x4   :  { %p121_p0 = scmp.ne.s32.totalorder %s15_s10, %s120_s11  ;;  %p126_p2 = scmp.lt.s32.totalorder %s120_s11, %s120_s11 }
   0x6   :  { %p127_p3 = por %p126_p2, %p125_p1 }
   0x8   :  { %p128_p4 = pnand %p127_p3, %p121_p0 }
   0xa   :  { %131 = shalt.err (!%p128_p4)
}
   0xb   :  { %s157_s12 = smov 64   ;;  %s158_s13 = smov 4  }
   0xc   :  { %20 = dma.hbm_to_vmem [thread:$0]  %s192_s0, 128, %s15_s10, [#allocation3], %s157_s12, %s157_s12, %s158_s13  }
   0xd   :  { %152 = dma.done.wait [#allocation3], 128  }
   0xe   :  { %153 = vsyncadd [#allocation3], 4294967168  ;;  %v26_v0 = vld [vmem:[#allocation2] sm:$0xf]  ;;  %v27_v1 = vld [vmem:[#allocation2 + $0x4] sm:$0xf]  ;;  %v47_v12 = vlaneseq }
   0xf   :  { %v28_v2 = vunpack.c.l.bf16 %v26_v0  ;;  %v29_v3 = vunpack.c.l.bf16 %v27_v1  ;;  %v159_v13 = vmov 839922192   ;;  %v160_v16 = vmov 1985246804   ;;  %v62_v18 = vld [vmem:[%s193_s1] sm:$0x1] }
  0x10   :  { %v45_v14 = vunpack.c.l.s4 %v159_v13  ;;  %v48_v15 = vshrl.u32 %v47_v12, 7  ;;  %v52_v17 = vunpack.c.l.s4 %v160_v16  ;;  %v64_v21 = vpack.i.b16 %v62_v18, %v62_v18  ;;  %s161_s17 = smov [#allocation5]  }
  0x11   :  { %v30_v4 = vmul.f32 %v28_v2, %v28_v2  ;;  %v31_v5 = vmul.f32 %v29_v3, %v29_v3  ;;  %s83_s18 = sshll.u32 %s161_s17, 4  ;;  %s84_s18 = int_to_ptr.vmem [resolvable:$true] %s83_s18 }
  0x12   :  { %v46_v19 = vunpack.c.0.s8 %v45_v14  ;;  %v53_v20 = vunpack.c.0.s8 %v52_v17  ;;  %v68_v22 = vsub.s32 0, %v48_v15  ;;  %s132_s1 = scalar_lea.vmem %s84_s18, 128  ;;  %p137_p6 = scmp.lt.s32.totalorder %s84_s18, %s84_s18 }
  0x13   :  { %32 = vadd.xlane.f32.xlu0 %v30_v4  ;;  %p133_p5 = scmp.ne.s32.totalorder %s84_s18, %s132_s1  ;;  %p138_p7 = scmp.lt.s32.totalorder %s132_s1, %s132_s1 }
  0x14   :  { %v49_v24 = vsub.s32 %v46_v19, %v48_v15  ;;  %v56_v25 = vsub.s32 %v53_v20, %v48_v15  ;;  %v69_v26 = vrot.slane %v64_v21, %v68_v22 }
  0x15   :  { %p139_p8 = por %p138_p7, %p137_p6 }
  0x16   :  { %v95_v31 = vcombine.low %v69_v26, %v69_v26 }
  0x17   :  { %34 = vadd.xlane.f32.xlu0 %v31_v5  ;;  %p140_p9 = pnand %p139_p8, %p133_p5 }
  0x9c   :  { %v33_v6 = vpop.xlane.xlu0 %32 }
  0x9d   :  { %v36_v7 = vmul.f32 0.0078125, %v33_v6 }
  0x9f   :  { %v38_v8 = vadd.f32 1e-06, %v36_v7 }
  0xa0   :  { %v35_v9 = vpop.xlane.xlu0 %34 }
  0xa1   :  { %v37_v10 = vmul.f32 0.0078125, %v35_v9  ;;  %108 = vrsqrt.f32 %v38_v8 }
  0xa3   :  { %v39_v11 = vadd.f32 1e-06, %v37_v10 }
  0xa5   :  { %110 = vrsqrt.f32 %v39_v11 }
  0xae   :  { %v109_v23 = vpop.eup %108 }
  0xb2   :  { %v111_v27 = vpop.eup %110 }
  0xb3   :  { %v42_v28 = vpack.c.bf16 %v111_v27, %v109_v23 }
  0xb5   :  { %v50_v29 = vrot.slane %v42_v28, %v49_v24  ;;  %v57_v30 = vrot.slane %v42_v28, %v56_v25 }
  0xb7   :  { %v60_v32 = vmul.bf16 %v50_v29, %v26_v0  ;;  %v61_v33 = vmul.bf16 %v57_v30, %v27_v1 }
  0xb9   :  { %v74_v34 = vmul.bf16 %v95_v31, %v60_v32  ;;  %v75_v35 = vmul.bf16 %v95_v31, %v61_v33 }
  0xbb   :  { %v101_v36 = vcombine.low %v74_v34, %v75_v35 }
  0xbd   :  { %100 = vst [vmem:[#allocation5] sm:$0xff] %v101_v36  }
  0xbe   :  { %143 = shalt.err (!%p140_p9)
}
  0xbf   :  { %89 = dma.vmem_to_hbm [thread:$0]  %s84_s18, 128, %s194_s2, [#allocation4], %s157_s12, %s157_s12, %s158_s13  }
  0xc0   :  { %154 = dma.done.wait [#allocation4], 128  }
  0xc1   :  { %155 = vsyncadd [#allocation4], 4294967168 }
  0xc2   :  { %93 = vsyncpa [#allocation3], 1 }
  0xc3   :  { %94 = vsyncpa [#allocation4], 1 }

</bundles_post_ra>
